<compile_context>
chip_gen: v7x
topology: tpu7x:2x2x1
jax: 0.10.0
libtpu: 0.0.40
codegen_flags: <defaults>
</compile_context>

<pallas_src>
import jax
import jax.numpy as jnp
from jax.experimental import pallas as pl
from jax.experimental.pallas import tpu as pltpu

_LANE = 128


def quad_kernel(params_ref, x_ref, o_ref):
    # params_ref: SMEM (3,) f32 -> a, b, c scalars
    a = params_ref[0]
    b = params_ref[1]
    c = params_ref[2]
    # Upcast in-register only (no extra HBM traffic); v5e has no bf16 VPU so f32
    # math is the safe common denominator across generations. Mem-bound anyway.
    x = x_ref[...].astype(jnp.float32)
    # Horner form: one fewer VPU multiply than a*x*x + b*x + c.
    o_ref[...] = ((a * x + b) * x + c).astype(o_ref.dtype)


def _choose_layout(total, itemsize, target_block_bytes):
    """Pick (width, rows, rows_per_block, padded_total) for a lane-dense 2D slab."""
    # Dtype-aware sublane tile: 8 rows for 4-byte, 16 for bf16, 32 for int8/fp8.
    sub = 8 * max(1, 4 // itemsize)

    # Widest lane-dense width (multiple of 128) that divides the element count
    # exactly (zero-copy reshape) and leaves at least one full (sub, width) tile.
    width = None
    for cand in (2048, 1024, 512, 256, 128):
        if total % cand == 0 and total // cand >= sub:
            width = cand
            break
    if width is None:
        for cand in (2048, 1024, 512, 256, 128):
            if total % cand == 0:
                width = cand
                break

    if width is None:
        # Rare slow path: element count not divisible by 128 -> pad the tail.
        width = _LANE
        padded = pl.cdiv(total, width) * width
    else:
        padded = total

    rows = padded // width
    # Rows per block sized so one block is ~target_block_bytes, rounded to a
    # multiple of the sublane tile.  The ragged last grid step (if any) is
    # handled by Pallas write-masking, so rows need not be a block multiple.
    rpb = max(sub, (target_block_bytes // (width * itemsize)) // sub * sub)
    if rows <= sub:
        rpb = rows                      # block spans the whole (tiny) row dim
    else:
        rpb = min(rpb, (rows // sub) * sub)
    return width, rows, rpb, padded


def net_forward(x, a, b, c, *, target_block_bytes=4 << 20, donate_x=False):
    """Pallas TPU implementation of Net.forward: y = a*x*x + b*x + c."""
    orig_shape = x.shape
    dtype = x.dtype
    total = x.size
    itemsize = jnp.dtype(dtype).itemsize

    width, rows, rpb, padded = _choose_layout(total, itemsize, target_block_bytes)

    x_flat = jnp.ravel(x)               # contiguous flatten: free (bitcast)
    if padded != total:
        # Only element counts not divisible by 128 pay this copy (< 128 elems pad).
        # TODO(synk): a 1-D ragged-block kernel could avoid even this copy.
        x_flat = jnp.pad(x_flat, (0, padded - total))
    x2d = x_flat.reshape(rows, width)    # exact reshape: free (bitcast)

    # Tiny SMEM parameter vector; kernel math is f32 regardless of x dtype.
    params = jnp.stack([
        jnp.asarray(a, jnp.float32).reshape(()),
        jnp.asarray(b, jnp.float32).reshape(()),
        jnp.asarray(c, jnp.float32).reshape(()),
    ])

    grid = (pl.cdiv(rows, rpb),)         # ragged last block is masked by Pallas
    block_bytes = rpb * width * itemsize
    # Double-buffered in+out (4x block) plus headroom; raise the scoped VMEM
    # limit explicitly so larger blocks also compile on v5e's 16 MiB default.
    vmem_limit = int(max(32 << 20, 6 * block_bytes))

    cost = pl.CostEstimate(
        flops=4 * total,                 # Horner: 2 mul + 2 add per element
        transcendentals=0,
        bytes_accessed=2 * total * itemsize,
    )

    out2d = pl.pallas_call(
        quad_kernel,
        out_shape=jax.ShapeDtypeStruct((rows, width), dtype),
        grid_spec=pltpu.PrefetchScalarGridSpec(
            num_scalar_prefetch=0,
            grid=grid,
            in_specs=[
                pl.BlockSpec(memory_space=pltpu.SMEM),        # (3,) a, b, c
                pl.BlockSpec((rpb, width), lambda i: (i, 0)),
            ],
            out_specs=pl.BlockSpec((rpb, width), lambda i: (i, 0)),
        ),
        compiler_params=pltpu.CompilerParams(
            # TODO(synk): verify on v7x xprof that this axis shards across both
            # TensorCores; if one TC is idle, switch to pltpu.CORE_PARALLEL.
            dimension_semantics=("parallel",),
            vmem_limit_bytes=vmem_limit,
        ),
        cost_estimate=cost,
        input_output_aliases=({1: 0} if donate_x else {}),
    )(params, x2d)

    y_flat = out2d.reshape(-1)
    if padded != total:
        y_flat = y_flat[:total]
    return y_flat.reshape(orig_shape)


if __name__ == "__main__":
    key = jax.random.PRNGKey(0)
    kx, ka, kb, kc = jax.random.split(key, 4)

    # Parameters matching torch.nn.Parameter(torch.rand(1)).
    a = jax.random.uniform(ka, (1,), dtype=jnp.float32)[0]
    b = jax.random.uniform(kb, (1,), dtype=jnp.float32)[0]
    c = jax.random.uniform(kc, (1,), dtype=jnp.float32)[0]

    # Small example input (module is shape-agnostic elementwise).
    x = jax.random.normal(kx, (2, 4, 16, 16), dtype=jnp.float32)

    y = net_forward(x, a, b, c)
    jax.block_until_ready(y)

    # Reference check in plain JAX (tolerance covers Horner-form reassociation).
    y_ref = a * x * x + b * x + c
    assert y.shape == x.shape, "shape mismatch"
    assert jnp.allclose(y, y_ref, atol=1e-5, rtol=1e-5), "mismatch vs reference"

    print("KERNEL_OK")
</pallas_src>

<mosaic_0001>
module attributes {stable_mosaic.version = 11 : i64} {
  func.func @quad_kernel(%arg0: i32, %arg1: memref<3xf32, #tpu.memory_space<smem>>, %arg2: memref<8x256xf32, #tpu.memory_space<vmem>>, %arg3: memref<8x256xf32, #tpu.memory_space<vmem>>) attributes {dimension_semantics = [#tpu.dimension_semantics<parallel>], iteration_bounds = array<i64: 1>, scalar_prefetch = 0 : i64, scratch_operands = 0 : i64, tpu.core_type = #tpu.core_type<tc>, window_params = [{transform_indices = @transform_0, window_bounds = array<i64: 3>}, {transform_indices = @transform_1, window_bounds = array<i64: 8, 256>}, {transform_indices = @transform_2, window_bounds = array<i64: 8, 256>}]} {
    %c0 = arith.constant 0 : index
    %0 = memref.load %arg1[%c0] : memref<3xf32, #tpu.memory_space<smem>>
    %c1 = arith.constant 1 : index
    %1 = memref.load %arg1[%c1] : memref<3xf32, #tpu.memory_space<smem>>
    %c2 = arith.constant 2 : index
    %2 = memref.load %arg1[%c2] : memref<3xf32, #tpu.memory_space<smem>>
    %c0_0 = arith.constant 0 : index
    %c0_1 = arith.constant 0 : index
    %3 = vector.load %arg2[%c0_0, %c0_1] : memref<8x256xf32, #tpu.memory_space<vmem>>, vector<8x256xf32>
    %4 = vector.broadcast %0 : f32 to vector<8x256xf32>
    %5 = arith.mulf %4, %3 : vector<8x256xf32>
    %6 = vector.broadcast %1 : f32 to vector<8x256xf32>
    %7 = arith.addf %5, %6 : vector<8x256xf32>
    %8 = arith.mulf %7, %3 : vector<8x256xf32>
    %9 = vector.broadcast %2 : f32 to vector<8x256xf32>
    %10 = arith.addf %8, %9 : vector<8x256xf32>
    %c0_2 = arith.constant 0 : index
    %c0_3 = arith.constant 0 : index
    %11 = vector.load %arg3[%c0_2, %c0_3] : memref<8x256xf32, #tpu.memory_space<vmem>>, vector<8x256xf32>
    tpu.vector_store %arg3[%c0_2, %c0_3], %10 {strides = array<i32>} : memref<8x256xf32, #tpu.memory_space<vmem>>, vector<8x256xf32>,
    return
  }
  func.func @transform_0(%arg0: i32) -> i32 {
    %c0_i32 = arith.constant 0 : i32
    %c0_i32_0 = arith.constant 0 : i32
    return %c0_i32 : i32
  }
  func.func @transform_1(%arg0: i32) -> (i32, i32) {
    %c0_i32 = arith.constant 0 : i32
    %c0_i32_0 = arith.constant 0 : i32
    return %arg0, %c0_i32 : i32, i32
  }
  func.func @transform_2(%arg0: i32) -> (i32, i32) {
    %c0_i32 = arith.constant 0 : i32
    %c0_i32_0 = arith.constant 0 : i32
    return %arg0, %c0_i32 : i32, i32
  }
}

</mosaic_0001>

<bundles_post_ra>
// kernel: tpu_custom_call.1
= control target key start
LH: loop header
LB: loop body
LE: loop exit
PB: predicated region body
PF: predicated region fallthrough
CT: control target
= control target key end

     0   :  { %7 = vsyncpa [#allocation5], 0  ;;  %s188_s0 = inlined_call_operand.hbm [shape: f32[3], index: 0, kind: input, shape index: {}]   ;;  %s189_s1 = inlined_call_operand.hbm [shape: f32[8,256], index: 1, kind: input, shape index: {}]   ;;  %s190_s2 = inlined_call_operand.hbm [shape: f32[8,256], index: 2, kind: output, shape index: {}]  }
   0x1   :  { %8 = vsyncpa [#allocation3], 0 }
   0x2   :  { %9 = vsyncpa [#allocation4], 0  ;;  %s74_s11 = scalar_lea.hbm %s188_s0, 16 }
   0x3   :  { %p75_p0 = scmp.ne.s32.totalorder %s188_s0, %s74_s11  ;;  %p78_p1 = scmp.lt.u32.totalorder %s74_s11, %s188_s0 }
   0x5   :  { %p80_p2 = pnand %p78_p1, %p75_p0 }
   0x7   :  { %83 = shalt.err (!%p80_p2)
}
   0x8   :  { %s134_s16 = smov [#allocation2]   ;;  %s135_s19 = smov [#allocation6]  }
   0x9   :  { %17 = dma.hbm_to_smem %s188_s0, 16, %s134_s16, [#allocation5]  }
   0xa   :  { %s24_s20 = sshll.u32 %s135_s19, 4  ;;  %s84_s23 = scalar_lea.hbm %s189_s1, 256  ;;  %s25_s20 = int_to_ptr.vmem [resolvable:$true] %s24_s20 }
   0xb   :  { %p85_p3 = scmp.ne.s32.totalorder %s189_s1, %s84_s23  ;;  %p88_p4 = scmp.lt.u32.totalorder %s84_s23, %s189_s1 }
   0xd   :  { %p90_p5 = pnand %p88_p4, %p85_p3 }
   0xf   :  { %93 = shalt.err (!%p90_p5)
}
  0x10   :  { %s94_s28 = scalar_lea.vmem %s25_s20, 256  ;;  %p99_p7 = scmp.lt.s32.totalorder %s25_s20, %s25_s20 }
  0x11   :  { %p95_p6 = scmp.ne.s32.totalorder %s25_s20, %s94_s28  ;;  %p100_p8 = scmp.lt.s32.totalorder %s94_s28, %s94_s28 }
  0x13   :  { %p101_p9 = por %p100_p8, %p99_p7 }
  0x15   :  { %p102_p10 = pnand %p101_p9, %p95_p6 }
  0x17   :  { %105 = shalt.err (!%p102_p10)
}
  0x18   :  { %27 = dma.hbm_to_vmem [thread:$0]  %s189_s1, 256, %s25_s20, [#allocation3]  }
  0x19   :  { %128 = dma.done.wait [#allocation5], 16  }
  0x1a   :  { %129 = vsyncadd [#allocation5], 4294967280 }
  0x1b   :  { %130 = dma.done.wait [#allocation3], 256  }
  0x1c   :  { %131 = vsyncadd [#allocation3], 4294967040 }
  0x1d   :  { %34 = sfence }
  0x1e   :  { %s35_s30 = sld [smem:[#allocation2]]  ;;  %s69_s3 = sld [smem:[#allocation2 + $0x1]]  ;;  %v38_v0 = vld [vmem:[#allocation6] sm:$0xff]  ;;  %v39_v1 = vld [vmem:[#allocation6 + $0x8] sm:$0xff] }
  0x1f   :  { %s70_s4 = sld [smem:[#allocation2 + $0x2]]  ;;  %s136_s5 = smov [#allocation7]  }
  0x20   :  { %s59_s6 = sshll.u32 %s136_s5, 4  ;;  %s60_s6 = int_to_ptr.vmem [resolvable:$true] %s59_s6 }
  0x21   :  { %s106_s1 = scalar_lea.vmem %s60_s6, 256  ;;  %p111_p12 = scmp.lt.s32.totalorder %s60_s6, %s60_s6 }
  0x22   :  { %p107_p11 = scmp.ne.s32.totalorder %s60_s6, %s106_s1  ;;  %p112_p13 = scmp.lt.s32.totalorder %s106_s1, %s106_s1 }
  0x24   :  { %v40_v2 = vstv %s35_s30  ;;  %v43_v3 = vstv %s69_s3  ;;  %p113_p0 = por %p112_p13, %p111_p12 }
  0x25   :  { %v41_v4 = vmul.f32 %v40_v2, %v38_v0  ;;  %v42_v5 = vmul.f32 %v40_v2, %v39_v1  ;;  %v48_v8 = vstv %s70_s4 }
  0x26   :  { %p114_p1 = pnand %p113_p0, %p107_p11 }
  0x27   :  { %v44_v6 = vadd.f32 %v43_v3, %v41_v4  ;;  %v45_v7 = vadd.f32 %v43_v3, %v42_v5 }
  0x29   :  { %v46_v9 = vmul.f32 %v44_v6, %v38_v0  ;;  %v47_v10 = vmul.f32 %v45_v7, %v39_v1 }
  0x2b   :  { %v49_v11 = vadd.f32 %v48_v8, %v46_v9  ;;  %v50_v12 = vadd.f32 %v48_v8, %v47_v10 }
  0x2d   :  { %51 = vst [vmem:[#allocation7] sm:$0xff] %v49_v11  ;;  %52 = vst [vmem:[#allocation7 + $0x8] sm:$0xff] %v50_v12 }
  0x2e   :  { %117 = shalt.err (!%p114_p1)
}
  0x2f   :  { %s118_s9 = scalar_lea.hbm %s190_s2, 256 }
  0x30   :  { %p119_p2 = scmp.ne.s32.totalorder %s190_s2, %s118_s9  ;;  %p122_p3 = scmp.lt.u32.totalorder %s118_s9, %s190_s2 }
  0x32   :  { %p124_p4 = pnand %p122_p3, %p119_p2 }
  0x34   :  { %127 = shalt.err (!%p124_p4)
}
  0x35   :  { %62 = dma.vmem_to_hbm [thread:$0]  %s60_s6, 256, %s190_s2, [#allocation4]  }
  0x36   :  { %132 = dma.done.wait [#allocation4], 256  }
  0x37   :  { %133 = vsyncadd [#allocation4], 4294967040 }
  0x38   :  { %66 = vsyncpa [#allocation3], 1 }
  0x39   :  { %67 = vsyncpa [#allocation4], 1 }
  0x3a   :  { %68 = vsyncpa [#allocation5], 1 }

</bundles_post_ra>
